<compile_context>
chip_gen: v7x
topology: tpu7x:2x2x1
jax: 0.10.0
libtpu: 0.0.40
codegen_flags: <defaults>
</compile_context>

<pallas_src>
import functools

import jax
import jax.numpy as jnp
from jax import lax
from jax.experimental import pallas as pl
from jax.experimental.pallas import tpu as pltpu


def _round_up(x, m):
    return ((x + m - 1) // m) * m


@functools.lru_cache(maxsize=None)
def _vmem_limit():
    """Scoped-VMEM budget derived from the actual chip (review item)."""
    try:
        cap = int(pltpu.get_tpu_info().vmem_capacity_bytes)
        return max(32 * 1024 * 1024, min((cap * 3) // 4, 112 * 1024 * 1024))
    except Exception:
        return 64 * 1024 * 1024   # known-good conservative fallback


# ----------------------------------------------------------------------------
# Kernel 1: collapsed-K matmul + bias (+ ReLU).   out = act(x @ w + b)
# Used for 1x1 convs and the two stride-2 3x3 convs (via im2col).
# ----------------------------------------------------------------------------
def _mm_bias_kernel(x_ref, w_ref, b_ref, o_ref, *, relu):
    y = jnp.dot(x_ref[...], w_ref[...], preferred_element_type=jnp.float32)
    y = y + b_ref[...]
    if relu:
        y = jnp.maximum(y, 0.0)
    o_ref[...] = y.astype(o_ref.dtype)


def matmul_bias_act(x, w, bias, *, relu):
    """x:(M,K) bf16, w:(K,N) bf16 (BN folded), bias:(1,N) f32 -> (M,N) bf16."""
    M, K = x.shape
    N = w.shape[1]
    # Fixed large M tile: padding a remainder is cheaper than a tiny tile.
    TM = min(512, _round_up(M, 16))
    Mp = _round_up(M, TM)
    if Mp != M:
        x = jnp.pad(x, ((0, Mp - M), (0, 0)))
    out = pl.pallas_call(
        functools.partial(_mm_bias_kernel, relu=relu),
        out_shape=jax.ShapeDtypeStruct((Mp, N), x.dtype),
        grid_spec=pltpu.PrefetchScalarGridSpec(
            num_scalar_prefetch=0,
            grid=(Mp // TM,),
            in_specs=[
                pl.BlockSpec((TM, K), lambda i: (i, 0)),   # full K in one block
                pl.BlockSpec((K, N), lambda i: (0, 0)),    # weight fetched once
                pl.BlockSpec((1, N), lambda i: (0, 0)),
            ],
            out_specs=pl.BlockSpec((TM, N), lambda i: (i, 0)),
        ),
        compiler_params=pltpu.CompilerParams(
            dimension_semantics=("parallel",),
            vmem_limit_bytes=_vmem_limit(),
        ),
    )(x, w, bias)
    return out[:M] if Mp != M else out


# ----------------------------------------------------------------------------
# Kernel 2: fused stride-1 3x3 conv (any dilation) + bias (+ residual)(+ ReLU).
# The whole zero-padded NHWC image lives in VMEM; each grid step builds the
# (th*W, 9C) im2col patch in VMEM and performs ONE MXU dot against the
# (9C, Co) weight.  No patches array ever touches HBM.
# ----------------------------------------------------------------------------
def _conv3x3_kernel(*refs, dil, th, nh, wo, co, relu, has_res):
    if has_res:
        x_ref, w_ref, b_ref, r_ref, o_ref = refs
    else:
        x_ref, w_ref, b_ref, o_ref = refs
        r_ref = None

    d = dil
    c = x_ref.shape[-1]
    h0 = pl.multiple_of((pl.program_id(0) % nh) * th, th)

    # Build the (th*wo, 9*c) patch: 3 contiguous row-band loads (one per kh),
    # 3 static W shifts each, concatenated along the channel (lane) dim.
    taps = []
    for kh in range(3):
        band = x_ref[pl.ds(h0 + kh * d, th), :, :]          # (th, wp, c)
        for kw in range(3):
            taps.append(band[:, kw * d: kw * d + wo, :])    # (th, wo, c)
    patch = jnp.concatenate(taps, axis=-1).reshape(th * wo, 9 * c)

    # Single big MXU dot: M = th*wo, K = 9*c, N = co.
    y = jnp.dot(patch, w_ref[...], preferred_element_type=jnp.float32)
    y = y + b_ref[...]                                      # (1, co) broadcast
    if relu:
        y = jnp.maximum(y, 0.0)
    z = y.reshape(th, wo, co)
    if has_res:
        z = z + r_ref[...].astype(jnp.float32)
    # TODO(synk): for co<128 a sublane->lane repack to a (th, wo*co) lane-dense
    # block would make this store unmasked.
    o_ref[...] = z.astype(o_ref.dtype)


def _row_tile(h):
    if h <= 8:
        return h, h
    th = 8
    return th, _round_up(h, th)


def conv3x3_fused(x, p, *, dil, relu, residual=None):
    """x: (N,H,W,C) bf16 -> (N,H,W,Co) bf16; 3x3, stride 1, pad = dil."""
    n, h, w, c = x.shape
    co = p["w"].shape[1]
    d = dil
    th, ht = _row_tile(h)
    nh = ht // th
    # Halo (d rows/cols) + bottom padding so the row tile divides H exactly
    # (padded rows are computed on zeros and sliced off afterwards).
    xp = jnp.pad(x, ((0, 0), (d, d + (ht - h)), (d, d), (0, 0)))
    hp, wp = ht + 2 * d, w + 2 * d
    has_res = residual is not None

    ins = [xp, p["w"], p["bias"]]
    in_specs = [
        # Whole padded image per batch element; its block index only depends on
        # the image index, so it is DMA'd once per image and reused for all row
        # tiles.  TODO(synk): switch to a halo'd (th+2d)-row slab for v7x /
        # very large resolutions.
        pl.BlockSpec((None, hp, wp, c), lambda i: (i // nh, 0, 0, 0)),
        pl.BlockSpec((9 * c, co), lambda i: (0, 0)),
        pl.BlockSpec((1, co), lambda i: (0, 0)),
    ]
    if has_res:
        r = residual
        if ht != h:
            r = jnp.pad(r, ((0, 0), (0, ht - h), (0, 0), (0, 0)))
        ins.append(r)
        in_specs.append(
            pl.BlockSpec((None, th, w, co), lambda i: (i // nh, i % nh, 0, 0))
        )

    out = pl.pallas_call(
        functools.partial(_conv3x3_kernel, dil=d, th=th, nh=nh, wo=w, co=co,
                          relu=relu, has_res=has_res),
        out_shape=jax.ShapeDtypeStruct((n, ht, w, co), x.dtype),
        grid_spec=pltpu.PrefetchScalarGridSpec(
            num_scalar_prefetch=0,
            grid=(n * nh,),   # single flattened parallel axis
            in_specs=in_specs,
            out_specs=pl.BlockSpec(
                (None, th, w, co), lambda i: (i // nh, i % nh, 0, 0)
            ),
        ),
        compiler_params=pltpu.CompilerParams(
            dimension_semantics=("parallel",),
            vmem_limit_bytes=_vmem_limit(),
        ),
    )(*ins)
    if ht != h:
        out = out[:, :h]
    return out


# ----------------------------------------------------------------------------
# Glue paths for the few non-stride-1 convs
# ----------------------------------------------------------------------------
def _im2col(x, ksize, stride, pad, dilation):
    n, h, w, c = x.shape
    ho = (h + 2 * pad - dilation * (ksize - 1) - 1) // stride + 1
    wo = (w + 2 * pad - dilation * (ksize - 1) - 1) // stride + 1
    xp = jnp.pad(x, ((0, 0), (pad, pad), (pad, pad), (0, 0)))
    cols = []
    for kh in range(ksize):
        for kw in range(ksize):
            sl = xp[
                :,
                kh * dilation: kh * dilation + stride * (ho - 1) + 1: stride,
                kw * dilation: kw * dilation + stride * (wo - 1) + 1: stride,
                :,
            ]
            cols.append(sl)
    patches = jnp.concatenate(cols, axis=-1).reshape(n * ho * wo, ksize * ksize * c)
    return patches, (n, ho, wo)


def conv_im2col(x, p, *, stride, pad, dilation, relu):
    patches, (n, ho, wo) = _im2col(x, p["ksize"], stride, pad, dilation)
    y = matmul_bias_act(patches, p["w"], p["bias"], relu=relu)
    return y.reshape(n, ho, wo, -1)


def conv1x1(x, p, *, stride, relu):
    if stride > 1:
        x = x[:, ::stride, ::stride, :]
    n, h, w, c = x.shape
    y = matmul_bias_act(x.reshape(n * h * w, c), p["w"], p["bias"], relu=relu)
    return y.reshape(n, h, w, -1)


# ----------------------------------------------------------------------------
# Parameter initialization (deterministic, synthetic; BN folded into weights)
# ----------------------------------------------------------------------------
def _init_convbn(key, cin, cout, ksize):
    kw_, kg, kb, km, kv = jax.random.split(key, 5)
    fan_in = cin * ksize * ksize
    w = jax.random.normal(kw_, (ksize, ksize, cin, cout), jnp.float32) * (
        2.0 / fan_in
    ) ** 0.5
    gamma = 1.0 + 0.1 * jax.random.normal(kg, (cout,), jnp.float32)
    beta = 0.1 * jax.random.normal(kb, (cout,), jnp.float32)
    mean = 0.1 * jax.random.normal(km, (cout,), jnp.float32)
    var = 1.0 + 0.1 * jax.random.uniform(kv, (cout,), jnp.float32)
    scale = gamma / jnp.sqrt(var + 1e-5)
    bias = beta - mean * scale
    w2 = (w * scale).reshape(ksize * ksize * cin, cout).astype(jnp.bfloat16)
    return {"w": w2, "bias": bias.reshape(1, -1).astype(jnp.float32), "ksize": ksize}


def _init_conv_plain(key, cin, cout, ksize):
    fan_in = cin * ksize * ksize
    w = jax.random.normal(key, (ksize, ksize, cin, cout), jnp.float32) * (
        2.0 / fan_in
    ) ** 0.5
    w2 = w.reshape(ksize * ksize * cin, cout).astype(jnp.bfloat16)
    return {"w": w2, "bias": jnp.zeros((1, cout), jnp.float32), "ksize": ksize}


def init_feature_extraction(key, concat_feature=False, concat_feature_channel=12):
    keys = iter(jax.random.split(key, 128))
    params = {}
    params["firstconv"] = [
        _init_convbn(next(keys), 3, 32, 3),
        _init_convbn(next(keys), 32, 32, 3),
        _init_convbn(next(keys), 32, 32, 3),
    ]

    state = {"inplanes": 32}

    def make_layer(planes, blocks, stride):
        layer = []
        for b in range(blocks):
            blk = {
                "conv1": _init_convbn(next(keys), state["inplanes"], planes, 3),
                "conv2": _init_convbn(next(keys), planes, planes, 3),
            }
            if b == 0 and (stride != 1 or state["inplanes"] != planes):
                blk["down"] = _init_convbn(next(keys), state["inplanes"], planes, 1)
            state["inplanes"] = planes
            layer.append(blk)
        return layer

    params["layer1"] = make_layer(32, 3, 1)
    params["layer2"] = make_layer(128, 8, 2)
    params["layer3"] = make_layer(128, 3, 1)
    params["layer4"] = make_layer(128, 3, 1)

    if concat_feature:
        params["lastconv"] = [
            _init_convbn(next(keys), 128 * 3, 128, 3),
            _init_conv_plain(next(keys), 128, concat_feature_channel, 1),
        ]
    return params


# ----------------------------------------------------------------------------
# Forward pass (mirrors the PyTorch module)
# ----------------------------------------------------------------------------
def _apply_block(blk, x, stride, pad, dilation):
    padding = dilation if dilation > 1 else pad
    if stride == 1:
        out = conv3x3_fused(x, blk["conv1"], dil=dilation, relu=True)
    else:
        out = conv_im2col(
            x, blk["conv1"], stride=stride, pad=padding, dilation=dilation, relu=True
        )
    if "down" in blk:
        res = conv1x1(x, blk["down"], stride=stride, relu=False)
    else:
        res = x
    # conv2 is always stride 1; no ReLU after the residual add (GWCNet BasicBlock).
    out = conv3x3_fused(out, blk["conv2"], dil=dilation, relu=False, residual=res)
    return out


def _apply_layer(layer, x, stride, pad, dilation):
    for b, blk in enumerate(layer):
        s = stride if b == 0 else 1
        x = _apply_block(blk, x, s, pad, dilation)
    return x


def feature_extraction_forward(params, x_nchw, concat_feature=False):
    x = jnp.transpose(x_nchw, (0, 2, 3, 1)).astype(jnp.bfloat16)  # -> NHWC, bf16

    fc = params["firstconv"]
    x = conv_im2col(x, fc[0], stride=2, pad=1, dilation=1, relu=True)
    x = conv3x3_fused(x, fc[1], dil=1, relu=True)
    x = conv3x3_fused(x, fc[2], dil=1, relu=True)

    x = _apply_layer(params["layer1"], x, stride=1, pad=1, dilation=1)
    l2 = _apply_layer(params["layer2"], x, stride=2, pad=1, dilation=1)
    l3 = _apply_layer(params["layer3"], l2, stride=1, pad=1, dilation=1)
    l4 = _apply_layer(params["layer4"], l3, stride=1, pad=1, dilation=2)

    # TODO(synk): write l2/l3/l4 directly into channel slices of one slab (out
    # BlockSpec offset) to avoid this concatenate copy; keep NHWC bf16 if the
    # consumer allows to avoid the transpose + f32 upcast round-trip.
    gwc_nhwc = jnp.concatenate((l2, l3, l4), axis=-1)
    gwc_feature = jnp.transpose(gwc_nhwc, (0, 3, 1, 2)).astype(jnp.float32)

    if not concat_feature:
        return {"gwc_feature": gwc_feature}

    lc = params["lastconv"]
    y = conv3x3_fused(gwc_nhwc, lc[0], dil=1, relu=True)
    y = conv1x1(y, lc[1], stride=1, relu=False)
    concat_out = jnp.transpose(y, (0, 3, 1, 2)).astype(jnp.float32)
    return {"gwc_feature": gwc_feature, "concat_feature": concat_out}


# ----------------------------------------------------------------------------
if __name__ == "__main__":
    key = jax.random.PRNGKey(0)
    pkey, xkey = jax.random.split(key)

    # Input: NCHW, 3 channels (required by firstconv), small spatial size.
    x = jax.random.normal(xkey, (2, 3, 16, 16), dtype=jnp.float32)

    params = init_feature_extraction(pkey, concat_feature=True, concat_feature_channel=12)
    out = feature_extraction_forward(params, x, concat_feature=True)
    gwc = jax.block_until_ready(out["gwc_feature"])
    cat = jax.block_until_ready(out["concat_feature"])

    assert gwc.shape == (2, 384, 4, 4), gwc.shape
    assert cat.shape == (2, 12, 4, 4), cat.shape
    assert jnp.isfinite(gwc).all()
    assert jnp.isfinite(cat).all()
    print("KERNEL_OK")
</pallas_src>

<mosaic_0001>
module attributes {stable_mosaic.version = 11 : i64} {
  func.func @_mm_bias_kernel(%arg0: i32, %arg1: memref<128x27xbf16, #tpu.memory_space<vmem>>, %arg2: memref<27x32xbf16, #tpu.memory_space<vmem>>, %arg3: memref<1x32xf32, #tpu.memory_space<vmem>>, %arg4: memref<128x32xbf16, #tpu.memory_space<vmem>>) attributes {dimension_semantics = [#tpu.dimension_semantics<parallel>], iteration_bounds = array<i64: 1>, scalar_prefetch = 0 : i64, scratch_operands = 0 : i64, tpu.core_type = #tpu.core_type<tc>, window_params = [{transform_indices = @transform_0, window_bounds = array<i64: 128, 27>}, {pipeline_mode = #tpu.pipeline_mode<synchronous>, transform_indices = @transform_1, window_bounds = array<i64: 27, 32>}, {pipeline_mode = #tpu.pipeline_mode<synchronous>, transform_indices = @transform_2, window_bounds = array<i64: 1, 32>}, {transform_indices = @transform_3, window_bounds = array<i64: 128, 32>}]} {
    %c0 = arith.constant 0 : index
    %c0_0 = arith.constant 0 : index
    %0 = vector.load %arg1[%c0, %c0_0] : memref<128x27xbf16, #tpu.memory_space<vmem>>, vector<128x27xbf16>
    %c0_1 = arith.constant 0 : index
    %c0_2 = arith.constant 0 : index
    %1 = vector.load %arg2[%c0_1, %c0_2] : memref<27x32xbf16, #tpu.memory_space<vmem>>, vector<27x32xbf16>
    %cst = arith.constant dense<0.000000e+00> : vector<128x32xf32>
    %2 = tpu.matmul %0, %1, %cst {dimension_numbers = #tpu.dot_dimension_numbers<[1], [0], [0], [1], [0, 0, 1, 1], [], []>} : vector<128x27xbf16>, vector<27x32xbf16>, vector<128x32xf32> -> vector<128x32xf32>
    %c0_3 = arith.constant 0 : index
    %c0_4 = arith.constant 0 : index
    %3 = vector.load %arg3[%c0_3, %c0_4] : memref<1x32xf32, #tpu.memory_space<vmem>>, vector<1x32xf32>
    %4 = vector.broadcast %3 : vector<1x32xf32> to vector<128x32xf32>
    %5 = arith.addf %2, %4 : vector<128x32xf32>
    %cst_5 = arith.constant 0.000000e+00 : f32
    %6 = vector.broadcast %cst_5 : f32 to vector<128x32xf32>
    %7 = arith.maximumf %5, %6 : vector<128x32xf32>
    %8 = arith.truncf %7 : vector<128x32xf32> to vector<128x32xbf16>
    %c0_6 = arith.constant 0 : index
    %c0_7 = arith.constant 0 : index
    %9 = vector.load %arg4[%c0_6, %c0_7] : memref<128x32xbf16, #tpu.memory_space<vmem>>, vector<128x32xbf16>
    tpu.vector_store %arg4[%c0_6, %c0_7], %8 {strides = array<i32>} : memref<128x32xbf16, #tpu.memory_space<vmem>>, vector<128x32xbf16>,
    return
  }
  func.func @transform_0(%arg0: i32) -> (i32, i32) {
    %c0_i32 = arith.constant 0 : i32
    %c0_i32_0 = arith.constant 0 : i32
    return %arg0, %c0_i32 : i32, i32
  }
  func.func @transform_1(%arg0: i32) -> (i32, i32) {
    %c0_i32 = arith.constant 0 : i32
    %c0_i32_0 = arith.constant 0 : i32
    %c0_i32_1 = arith.constant 0 : i32
    return %c0_i32, %c0_i32_0 : i32, i32
  }
  func.func @transform_2(%arg0: i32) -> (i32, i32) {
    %c0_i32 = arith.constant 0 : i32
    %c0_i32_0 = arith.constant 0 : i32
    %c0_i32_1 = arith.constant 0 : i32
    return %c0_i32, %c0_i32_0 : i32, i32
  }
  func.func @transform_3(%arg0: i32) -> (i32, i32) {
    %c0_i32 = arith.constant 0 : i32
    %c0_i32_0 = arith.constant 0 : i32
    return %arg0, %c0_i32 : i32, i32
  }
}

</mosaic_0001>

<bundles_post_ra>
// kernel: tpu_custom_call.1
= control target key start
LH: loop header
LB: loop body
LE: loop exit
PB: predicated region body
PF: predicated region fallthrough
CT: control target
= control target key end

     0   :  { %8 = vsyncpa [#allocation3], 0  ;;  %s688_s0 = inlined_call_operand.hbm [shape: bf16[128,27], index: 0, kind: input, shape index: {}]   ;;  %s689_s1 = inlined_call_operand.hbm [shape: bf16[27,32], index: 1, kind: input, shape index: {}]   ;;  %s690_s2 = inlined_call_operand.hbm [shape: f32[1,32], index: 2, kind: input, shape index: {}]   ;;  %s691_s3 = inlined_call_operand.hbm [shape: bf16[128,32], index: 3, kind: output, shape index: {}]  }
   0x1   :  { %9 = vsyncpa [#allocation6], 0 }
   0x2   :  { %10 = vsyncpa [#allocation4], 0  ;;  %s573_s12 = smov [#allocation5]   ;;  %s574_s14 = smov [#allocation2]  }
   0x3   :  { %s28_s13 = sshll.u32 %s573_s12, 4  ;;  %s16_s15 = sshll.u32 %s574_s14, 4  ;;  %s29_s13 = int_to_ptr.vmem [resolvable:$true] %s28_s13  ;;  %s600_s15 = int_to_ptr.vmem [resolvable:$true] %s16_s15 }
   0x4   :  { %s479_s18 = scalar_lea.hbm %s689_s1, 256 }
   0x5   :  { %p480_p0 = scmp.ne.s32.totalorder %s689_s1, %s479_s18  ;;  %p483_p1 = scmp.lt.u32.totalorder %s479_s18, %s689_s1 }
   0x7   :  { %p485_p2 = pnand %p483_p1, %p480_p0 }
   0x9   :  { %488 = shalt.err (!%p485_p2)
}
   0xa   :  { %s489_s23 = scalar_lea.vmem %s29_s13, 256  ;;  %p494_p4 = scmp.lt.s32.totalorder %s29_s13, %s29_s13 }
   0xb   :  { %p490_p3 = scmp.ne.s32.totalorder %s29_s13, %s489_s23  ;;  %p495_p5 = scmp.lt.s32.totalorder %s489_s23, %s489_s23 }
   0xd   :  { %p496_p6 = por %p495_p5, %p494_p4 }
   0xf   :  { %p497_p7 = pnand %p496_p6, %p490_p3 }
  0x11   :  { %500 = shalt.err (!%p497_p7)
}
  0x12   :  { %s575_s24 = smov 64   ;;  %s576_s25 = smov 4  }
  0x13   :  { %34 = dma.hbm_to_vmem [thread:$0]  %s689_s1, 256, %s29_s13, [#allocation6], %s575_s24, %s575_s24, %s576_s25  }
  0x14   :  { %s501_s30 = scalar_lea.hbm %s688_s0, 1024 }
  0x15   :  { %p502_p8 = scmp.ne.s32.totalorder %s688_s0, %s501_s30  ;;  %p505_p9 = scmp.lt.u32.totalorder %s501_s30, %s688_s0 }
  0x17   :  { %p507_p10 = pnand %p505_p9, %p502_p8 }
  0x19   :  { %510 = shalt.err (!%p507_p10)
}
  0x1a   :  { %s511_s8 = scalar_lea.vmem %s600_s15, 1024  ;;  %p516_p12 = scmp.lt.s32.totalorder %s600_s15, %s600_s15 }
  0x1b   :  { %p512_p11 = scmp.ne.s32.totalorder %s600_s15, %s511_s8  ;;  %p517_p13 = scmp.lt.s32.totalorder %s511_s8, %s511_s8 }
  0x1d   :  { %p518_p0 = por %p517_p13, %p516_p12 }
  0x1f   :  { %p519_p1 = pnand %p518_p0, %p512_p11 }
  0x21   :  { %522 = shalt.err (!%p519_p1)
}
  0x22   :  { %22 = dma.hbm_to_vmem [thread:$0]  %s688_s0, 1024, %s600_s15, [#allocation3], %s575_s24, %s575_s24, %s576_s25  }
  0x23   :  { %s577_s10 = smov [#allocation7]   ;;  %s523_s14 = scalar_lea.hbm %s690_s2, 16 }
  0x24   :  { %s41_s11 = sshll.u32 %s577_s10, 4  ;;  %p524_p2 = scmp.ne.s32.totalorder %s690_s2, %s523_s14  ;;  %s42_s11 = int_to_ptr.vmem [resolvable:$true] %s41_s11 }
  0x25   :  { %p527_p3 = scmp.lt.u32.totalorder %s523_s14, %s690_s2 }
  0x27   :  { %p529_p4 = pnand %p527_p3, %p524_p2 }
  0x29   :  { %532 = shalt.err (!%p529_p4)
}
  0x2a   :  { %s533_s20 = scalar_lea.vmem %s42_s11, 16  ;;  %s537_s0 = scalar_lea.vmem %s42_s11, 32 }
  0x2b   :  { %p534_p5 = scmp.ne.s32.totalorder %s42_s11, %s533_s20  ;;  %p538_p6 = scmp.lt.s32.totalorder %s42_s11, %s42_s11 }
  0x2c   :  { %p539_p7 = scmp.lt.s32.totalorder %s537_s0, %s533_s20 }
  0x2e   :  { %p540_p8 = por %p539_p7, %p538_p6 }
  0x30   :  { %p541_p9 = pnand %p540_p8, %p534_p5 }
  0x32   :  { %544 = shalt.err (!%p541_p9)
}
  0x33   :  { %44 = dma.hbm_to_vmem [thread:$0]  %s690_s2, 16, %s42_s11, [#allocation6]  }
  0x34   :  { %567 = dma.done.wait [#allocation3], 1024  }
  0x35   :  { %568 = vsyncadd [#allocation3], 4294966272 }
  0x36   :  { %569 = dma.done.wait [#allocation6], 272  }
  0x37   :  { %570 = vsyncadd [#allocation6], 4294967024  ;;  %vm158_vm0 = vcmask 1044480   ;;  %vm159_vm1 = vcmask 1045504   ;;  %v578_v0 = vmov 65535   ;;  %vm133_vm2 = vcmask 220160  }
  0x38   :  { %v160_v1 = vsel %vm158_vm0, 4294967295, %v578_v0  ;;  %v469_v2 = vld [vmem:[#allocation5] sm:$0xff]   ;;  %v470_v4 = vld [vmem:[#allocation5 + $0x8] sm:$0x3f]   ;;  %v475_v10 = vld [vmem:[#allocation2 + $0x10] sm:$0xff]   ;;  %vm342_vm3 = vcmask 257024  }
  0x39   :  { %v161_v3 = vsel %vm159_vm1, %v160_v1, 0  ;;  %438 = vmatprep.subr.bf16.mxu0 %v469_v2  ;;  %458 = vmatprep.subr.bf16.mxu1 %v469_v2  ;;  %v471_v5 = vld [vmem:[#allocation2] sm:$0xff]   ;;  %v473_v8 = vld [vmem:[#allocation2 + $0x8] sm:$0xff]   ;;  %v476_v11 = vld [vmem:[#allocation2 + $0x30] sm:$0xff]   ;;  %s579_s2 = smov [#allocation8]  }
  0x3a   :  { %439 = vmatpush3.bf16.msra.mxu0 %v469_v2  ;;  %460 = vmatpush3.bf16.msra.mxu1 %v469_v2  ;;  %v163_v6 = vand.u32 %v470_v4, %v161_v3  ;;  %v472_v7 = vld [vmem:[#allocation2 + $0x20] sm:$0xff]   ;;  %v474_v9 = vld [vmem:[#allocation2 + $0x28] sm:$0xff]   ;;  %v477_v12 = vld [vmem:[#allocation2 + $0x18] sm:$0xff]   ;;  %s364_s22 = sshll.u32 %s579_s2, 4  ;;  %s365_s22 = int_to_ptr.vmem [resolvable:$true] %s364_s22 }
  0x3b   :  { %442 = vmatprep.mubr.msk.bf16.mxu0 %vm133_vm2, %v471_v5  ;;  %450 = vmatprep.mubr.msk.bf16.mxu1 %vm133_vm2, %v472_v7  ;;  %v478_v13 = vld [vmem:[#allocation2 + $0x38] sm:$0xff]   ;;  %v377_v14 = vld [vmem:[#allocation7] ss:$0 sm:$0xff]  ;;  %s545_s23 = scalar_lea.vmem %s365_s22, 1024  ;;  %p550_p11 = scmp.lt.s32.totalorder %s365_s22, %s365_s22 }
  0x3c   :  { %440 = vmatprep.subr.bf16.mxu0 %v163_v6  ;;  %459 = vmatprep.subr.bf16.mxu1 %v163_v6  ;;  %p546_p10 = scmp.ne.s32.totalorder %s365_s22, %s545_s23  ;;  %p551_p12 = scmp.lt.s32.totalorder %s545_s23, %s545_s23 }
  0x3e   :  { %441 = vmatpush3.bf16.msra.mxu0 %v163_v6  ;;  %461 = vmatpush3.bf16.msra.mxu1 %v163_v6  ;;  %p552_p13 = por %p551_p12, %p550_p11 }
  0x40   :  { %p553_p0 = pnand %p552_p13, %p546_p10 }
  0x41   :  { %443 = vmatmul.mubr.msk.bf16.vlgmr.msra.gmra.mrb[0].mxu0 %vm133_vm2, %v473_v8  ;;  %451 = vmatmul.mubr.msk.bf16.vlgmr.msra.gmra.mrb[0].mxu1 %vm133_vm2, %v474_v9 }
  0x42   :  { %446 = vmatprep.mubr.msk.bf16.mxu0 %vm133_vm2, %v475_v10  ;;  %454 = vmatprep.mubr.msk.bf16.mxu1 %vm133_vm2, %v476_v11 }
  0x49   :  { %447 = vmatmul.mubr.msk.bf16.gmra.mrb[4].mxu0 %vm133_vm2, %v477_v12  ;;  %455 = vmatmul.mubr.msk.bf16.gmra.mrb[4].mxu1 %vm133_vm2, %v478_v13 }
 0x114   :  { %v444_v15 = vpop.f32.mrb[0].mxu0  ;;  %v452_v16 = vpop.f32.mrb[0].mxu1 }
 0x115   :  { %v208_v17 = vadd.f32 %v444_v15, %v377_v14  ;;  %v240_v18 = vadd.f32 %v452_v16, %v377_v14  ;;  %v199_v19 = vpop.f32.mrb[1].mxu0  ;;  %v231_v20 = vpop.f32.mrb[1].mxu1 }
 0x116   :  { %v200_v21 = vadd.f32 %v377_v14, %v199_v19  ;;  %v232_v22 = vadd.f32 %v377_v14, %v231_v20  ;;  %v445_v23 = vpop.f32.mrb[2].mxu0  ;;  %v453_v24 = vpop.f32.mrb[2].mxu1 }
 0x117   :  { %v264_v25 = vmax.f32 %v208_v17, 0.0  ;;  %v272_v26 = vmax.f32 %v240_v18, 0.0  ;;  %v211_v27 = vadd.f32 %v445_v23, %v377_v14  ;;  %v243_v28 = vadd.f32 %v453_v24, %v377_v14  ;;  %v202_v29 = vpop.f32.mrb[3].mxu0  ;;  %v234_v30 = vpop.f32.mrb[3].mxu1 }
 0x118   :  { %v262_v31 = vmax.f32 %v200_v21, 0.0  ;;  %v270_v32 = vmax.f32 %v232_v22, 0.0  ;;  %v203_v33 = vadd.f32 %v377_v14, %v202_v29  ;;  %v235_v34 = vadd.f32 %v377_v14, %v234_v30 }
 0x119   :  { %v414_v35 = vpack.c.bf16 %v264_v25, %v264_v25  ;;  %v422_v36 = vpack.c.bf16 %v272_v26, %v272_v26  ;;  %v265_v37 = vmax.f32 %v211_v27, 0.0  ;;  %v273_v38 = vmax.f32 %v243_v28, 0.0 }
 0x11a   :  { %v412_v39 = vpack.c.bf16 %v262_v31, %v262_v31  ;;  %v420_v40 = vpack.c.bf16 %v270_v32, %v270_v32  ;;  %v263_v41 = vmax.f32 %v203_v33, 0.0  ;;  %v271_v42 = vmax.f32 %v235_v34, 0.0 }
 0x11b   :  { %345 = vst.msk [vmem:[#allocation8 + $0x8] sm:$0xf] %vm342_vm3, %v414_v35  ;;  %353 = vst.msk [vmem:[#allocation8 + $0x28] sm:$0xf] %vm342_vm3, %v422_v36  ;;  %v415_v43 = vpack.c.bf16 %v265_v37, %v265_v37  ;;  %v423_v44 = vpack.c.bf16 %v273_v38, %v273_v38 }
 0x11c   :  { %343 = vst.msk [vmem:[#allocation8] sm:$0xf] %vm342_vm3, %v412_v39  ;;  %351 = vst.msk [vmem:[#allocation8 + $0x20] sm:$0xf] %vm342_vm3, %v420_v40  ;;  %v413_v45 = vpack.c.bf16 %v263_v41, %v263_v41  ;;  %v421_v46 = vpack.c.bf16 %v271_v42, %v271_v42  ;;  %v448_v47 = vpop.f32.mrb[4].mxu0  ;;  %v456_v48 = vpop.f32.mrb[4].mxu1 }
 0x11d   :  { %346 = vst.msk [vmem:[#allocation8 + $0xc] sm:$0xf] %vm342_vm3, %v415_v43  ;;  %354 = vst.msk [vmem:[#allocation8 + $0x2c] sm:$0xf] %vm342_vm3, %v423_v44  ;;  %v224_v49 = vadd.f32 %v448_v47, %v377_v14  ;;  %v256_v50 = vadd.f32 %v456_v48, %v377_v14  ;;  %v215_v51 = vpop.f32.mrb[5].mxu0  ;;  %v247_v52 = vpop.f32.mrb[5].mxu1 }
 0x11e   :  { %344 = vst.msk [vmem:[#allocation8 + $0x4] sm:$0xf] %vm342_vm3, %v413_v45  ;;  %352 = vst.msk [vmem:[#allocation8 + $0x24] sm:$0xf] %vm342_vm3, %v421_v46  ;;  %v216_v53 = vadd.f32 %v377_v14, %v215_v51  ;;  %v248_v54 = vadd.f32 %v377_v14, %v247_v52  ;;  %v449_v55 = vpop.f32.mrb[6].mxu0  ;;  %v457_v56 = vpop.f32.mrb[6].mxu1 }
 0x11f   :  { %v268_v57 = vmax.f32 %v224_v49, 0.0  ;;  %v276_v58 = vmax.f32 %v256_v50, 0.0  ;;  %v227_v59 = vadd.f32 %v449_v55, %v377_v14  ;;  %v259_v60 = vadd.f32 %v457_v56, %v377_v14  ;;  %v218_v61 = vpop.f32.mrb[7].mxu0  ;;  %v250_v62 = vpop.f32.mrb[7].mxu1 }
 0x120   :  { %v266_v63 = vmax.f32 %v216_v53, 0.0  ;;  %v274_v0 = vmax.f32 %v248_v54, 0.0  ;;  %v219_v1 = vadd.f32 %v377_v14, %v218_v61  ;;  %v251_v2 = vadd.f32 %v377_v14, %v250_v62 }
 0x121   :  { %v418_v3 = vpack.c.bf16 %v268_v57, %v268_v57  ;;  %v426_v4 = vpack.c.bf16 %v276_v58, %v276_v58  ;;  %v269_v5 = vmax.f32 %v227_v59, 0.0  ;;  %v277_v6 = vmax.f32 %v259_v60, 0.0 }
 0x122   :  { %v416_v7 = vpack.c.bf16 %v266_v63, %v266_v63  ;;  %v424_v8 = vpack.c.bf16 %v274_v0, %v274_v0  ;;  %v267_v9 = vmax.f32 %v219_v1, 0.0  ;;  %v275_v10 = vmax.f32 %v251_v2, 0.0 }
 0x123   :  { %349 = vst.msk [vmem:[#allocation8 + $0x18] sm:$0xf] %vm342_vm3, %v418_v3  ;;  %357 = vst.msk [vmem:[#allocation8 + $0x38] sm:$0xf] %vm342_vm3, %v426_v4  ;;  %v419_v11 = vpack.c.bf16 %v269_v5, %v269_v5  ;;  %v427_v12 = vpack.c.bf16 %v277_v6, %v277_v6 }
 0x124   :  { %347 = vst.msk [vmem:[#allocation8 + $0x10] sm:$0xf] %vm342_vm3, %v416_v7  ;;  %355 = vst.msk [vmem:[#allocation8 + $0x30] sm:$0xf] %vm342_vm3, %v424_v8  ;;  %v417_v13 = vpack.c.bf16 %v267_v9, %v267_v9  ;;  %v425_v14 = vpack.c.bf16 %v275_v10, %v275_v10 }
 0x125   :  { %350 = vst.msk [vmem:[#allocation8 + $0x1c] sm:$0xf] %vm342_vm3, %v419_v11  ;;  %358 = vst.msk [vmem:[#allocation8 + $0x3c] sm:$0xf] %vm342_vm3, %v427_v12 }
 0x126   :  { %348 = vst.msk [vmem:[#allocation8 + $0x14] sm:$0xf] %vm342_vm3, %v417_v13  ;;  %356 = vst.msk [vmem:[#allocation8 + $0x34] sm:$0xf] %vm342_vm3, %v425_v14 }
 0x127   :  { %556 = shalt.err (!%p553_p0)
}
 0x128   :  { %s557_s28 = scalar_lea.hbm %s691_s3, 1024 }
 0x129   :  { %p558_p1 = scmp.ne.s32.totalorder %s691_s3, %s557_s28  ;;  %p561_p2 = scmp.lt.u32.totalorder %s557_s28, %s691_s3 }
 0x12b   :  { %p563_p3 = pnand %p561_p2, %p558_p1 }
 0x12d   :  { %566 = shalt.err (!%p563_p3)
}
 0x12e   :  { %370 = dma.vmem_to_hbm [thread:$0]  %s365_s22, 1024, %s691_s3, [#allocation4], %s575_s24, %s575_s24, %s576_s25  }
 0x12f   :  { %571 = dma.done.wait [#allocation4], 1024  }
 0x130   :  { %572 = vsyncadd [#allocation4], 4294966272 }
 0x131   :  { %374 = vsyncpa [#allocation3], 1 }
 0x132   :  { %375 = vsyncpa [#allocation6], 1 }
 0x133   :  { %376 = vsyncpa [#allocation4], 1 }

</bundles_post_ra>
